<compile_context>
chip_gen: v5e
topology: v5e:2x2
jax: 0.10.0
libtpu: 0.0.40
codegen_flags: <defaults>
</compile_context>

<pallas_src>
import jax
import jax.numpy as jnp
from jax.experimental import pallas as pl
from jax.experimental.pallas import tpu as pltpu


def _leaky(v):
    # torch.nn.LeakyReLU default negative_slope = 0.01
    return jnp.where(v >= 0, v, 0.01 * v)


def actor_kernel(x_ref, mask_ref,
                 w1_ref, b1_ref, w2_ref, b2_ref,
                 w3_ref, b3_ref, w4_ref, b4_ref,
                 out_ref):
    # x_ref: (1, Cin, N) bf16 -- transposed node features of this graph.
    x = x_ref[0]                                                    # [Cin, N]

    # lin1 -> leaky -> lin2 -> leaky -> lin3 -> leaky  (bf16 MXU, f32 accum)
    h = _leaky(jnp.dot(w1_ref[...], x, preferred_element_type=jnp.float32)
               + b1_ref[...]).astype(jnp.bfloat16)                  # [H, N]
    h = _leaky(jnp.dot(w2_ref[...], h, preferred_element_type=jnp.float32)
               + b2_ref[...]).astype(jnp.bfloat16)                  # [H, N]
    h = _leaky(jnp.dot(w3_ref[...], h, preferred_element_type=jnp.float32)
               + b3_ref[...]).astype(jnp.bfloat16)                  # [O, N]

    # lin4: [1, O] @ [O, N] -> lane-dense logits row [1, N] (f32)
    logits = (jnp.dot(w4_ref[...], h, preferred_element_type=jnp.float32)
              + b4_ref[...])                                        # [1, N]

    # mask -> -inf, then softmax along the lane (node) axis
    mask = mask_ref[0]                                              # [1, N] int32
    logits = jnp.where(mask != 0, logits, jnp.float32(-jnp.inf))
    m = jnp.max(logits, axis=-1, keepdims=True)
    p = jnp.exp(logits - m)
    denom = jnp.sum(p, axis=-1, keepdims=True)
    out_ref[0] = p / denom                                          # [1, N]


def init_linear(key, fan_in, fan_out):
    """PyTorch-style uniform init; weight stored as [out, in] (torch layout)."""
    kw, kb = jax.random.split(key)
    bound = 1.0 / float(fan_in) ** 0.5
    w = jax.random.uniform(kw, (fan_out, fan_in), jnp.float32, -bound, bound)
    b = jax.random.uniform(kb, (fan_out, 1), jnp.float32, -bound, bound)
    return w, b


def make_params(key, in_channels, hidden_channels, out_channels):
    keys = jax.random.split(key, 4)
    w1, b1 = init_linear(keys[0], in_channels, hidden_channels)       # lin1
    w2, b2 = init_linear(keys[1], hidden_channels, hidden_channels)   # lin2
    w3, b3 = init_linear(keys[2], hidden_channels, out_channels)      # lin3
    w4, b4 = init_linear(keys[3], out_channels, 1)                    # lin4
    return (w1, b1, w2, b2, w3, b3, w4, b4)


def actor_forward(x_dict, params, state=None):
    graph_nodes = x_dict['graph_nodes']            # [B, N, Cin]
    mask = x_dict['mask']                          # [B, N]
    batch_size = x_dict['graph_edges'].shape[0]    # B (as in the torch module)
    # picks_left / graph_edge_links are moved to device in torch but unused by
    # the MLP compute path.

    B, N, Cin = graph_nodes.shape
    assert B == batch_size

    w1, b1, w2, b2, w3, b3, w4, b4 = params
    # bf16 weights for the MXU; biases stay f32 (added after f32 accumulation).
    w1b, w2b, w3b, w4b = (w.astype(jnp.bfloat16) for w in (w1, w2, w3, w4))

    # Node axis on lanes: [B, Cin, N]; mask as [B, 1, N] int32.
    x_t = jnp.swapaxes(graph_nodes.astype(jnp.float32), 1, 2).astype(jnp.bfloat16)
    mask3 = mask.astype(jnp.int32).reshape(B, 1, N)

    def resident(arr):
        # full-array block, same block every grid step -> stays resident in VMEM
        shape = arr.shape
        return pl.BlockSpec(shape, lambda b, _s=shape: tuple(0 for _ in _s))

    out = pl.pallas_call(
        actor_kernel,
        out_shape=jax.ShapeDtypeStruct((B, 1, N), jnp.float32),
        grid=(B,),
        in_specs=[
            pl.BlockSpec((1, Cin, N), lambda b: (b, 0, 0)),   # per-graph node tile
            pl.BlockSpec((1, 1, N), lambda b: (b, 0, 0)),     # per-graph mask row
            resident(w1b), resident(b1),
            resident(w2b), resident(b2),
            resident(w3b), resident(b3),
            resident(w4b), resident(b4),
        ],
        out_specs=pl.BlockSpec((1, 1, N), lambda b: (b, 0, 0)),
        compiler_params=pltpu.CompilerParams(
            dimension_semantics=("parallel",)),
    )(x_t, mask3, w1b, b1, w2b, b2, w3b, b3, w4b, b4)

    return out.reshape(B, N), state


def reference_forward(x_dict, params):
    """Plain-JAX f32 reference mirroring the torch forward."""
    w1, b1, w2, b2, w3, b3, w4, b4 = params
    graph_nodes = x_dict['graph_nodes']
    mask = x_dict['mask']
    B, N, Cin = graph_nodes.shape
    x = graph_nodes.reshape(B * N, Cin).astype(jnp.float32)
    h = _leaky(x @ w1.T + b1.reshape(-1))
    h = _leaky(h @ w2.T + b2.reshape(-1))
    h = _leaky(h @ w3.T + b3.reshape(-1))
    logits = (h @ w4.T + b4.reshape(-1)).reshape(B, N)
    logits = jnp.where(mask != 0, logits, -jnp.inf)
    logits = logits - jnp.max(logits, axis=-1, keepdims=True)
    p = jnp.exp(logits)
    return p / jnp.sum(p, axis=-1, keepdims=True)


if __name__ == "__main__":
    # small, forward-consistent shapes
    B, N = 2, 16
    in_channels, hidden_channels, out_channels = 8, 32, 16

    key = jax.random.PRNGKey(0)
    k_nodes, k_mask, k_params = jax.random.split(key, 3)

    mask = jax.random.bernoulli(k_mask, 0.7, (B, N)).astype(jnp.int32)
    mask = mask.at[:, 0].set(1)   # at least one valid action per graph

    x_dict = {
        'graph_nodes': jax.random.normal(k_nodes, (B, N, in_channels), jnp.float32),
        'mask': mask,
        'graph_edges': jnp.zeros((B, 10, 2), jnp.int32),        # only .shape[0] used
        'graph_edge_links': jnp.zeros((B, 2, 10), jnp.int32),   # unused by MLP compute
        'picks_left': jnp.zeros((B,), jnp.int32),               # unused in compute
    }

    params = make_params(k_params, in_channels, hidden_channels, out_channels)

    probs, state = actor_forward(x_dict, params)
    probs = jax.block_until_ready(probs)

    ref = reference_forward(x_dict, params)
    assert probs.shape == (B, N)
    assert state is None
    assert jnp.allclose(jnp.sum(probs, axis=-1), 1.0, atol=1e-4)
    # kernel uses bf16 MXU operands (f32 accumulation) -> small tolerance slack
    assert jnp.allclose(probs, ref, rtol=5e-2, atol=2e-2), (probs, ref)

    print("KERNEL_OK")
</pallas_src>

<mosaic_0001>
module attributes {stable_mosaic.version = 11 : i64} {
  func.func @actor_kernel(%arg0: i32, %arg1: memref<1x8x16xbf16, #tpu.memory_space<vmem>>, %arg2: memref<1x1x16xi32, #tpu.memory_space<vmem>>, %arg3: memref<32x8xbf16, #tpu.memory_space<vmem>>, %arg4: memref<32x1xf32, #tpu.memory_space<vmem>>, %arg5: memref<32x32xbf16, #tpu.memory_space<vmem>>, %arg6: memref<32x1xf32, #tpu.memory_space<vmem>>, %arg7: memref<16x32xbf16, #tpu.memory_space<vmem>>, %arg8: memref<16x1xf32, #tpu.memory_space<vmem>>, %arg9: memref<1x16xbf16, #tpu.memory_space<vmem>>, %arg10: memref<1x1xf32, #tpu.memory_space<vmem>>, %arg11: memref<1x1x16xf32, #tpu.memory_space<vmem>>) attributes {dimension_semantics = [#tpu.dimension_semantics<parallel>], iteration_bounds = array<i64: 2>, scalar_prefetch = 0 : i64, scratch_operands = 0 : i64, tpu.core_type = #tpu.core_type<tc>, window_params = [{transform_indices = @transform_0, window_bounds = array<i64: 1, 8, 16>}, {transform_indices = @transform_1, window_bounds = array<i64: 1, 1, 16>}, {pipeline_mode = #tpu.pipeline_mode<synchronous>, transform_indices = @transform_2, window_bounds = array<i64: 32, 8>}, {pipeline_mode = #tpu.pipeline_mode<synchronous>, transform_indices = @transform_3, window_bounds = array<i64: 32, 1>}, {pipeline_mode = #tpu.pipeline_mode<synchronous>, transform_indices = @transform_4, window_bounds = array<i64: 32, 32>}, {pipeline_mode = #tpu.pipeline_mode<synchronous>, transform_indices = @transform_5, window_bounds = array<i64: 32, 1>}, {pipeline_mode = #tpu.pipeline_mode<synchronous>, transform_indices = @transform_6, window_bounds = array<i64: 16, 32>}, {pipeline_mode = #tpu.pipeline_mode<synchronous>, transform_indices = @transform_7, window_bounds = array<i64: 16, 1>}, {pipeline_mode = #tpu.pipeline_mode<synchronous>, transform_indices = @transform_8, window_bounds = array<i64: 1, 16>}, {pipeline_mode = #tpu.pipeline_mode<synchronous>, transform_indices = @transform_9, window_bounds = array<i64: 1, 1>}, {transform_indices = @transform_10, window_bounds = array<i64: 1, 1, 16>}]} {
    %c0 = arith.constant 0 : index
    %c0_0 = arith.constant 0 : index
    %c0_1 = arith.constant 0 : index
    %0 = vector.load %arg1[%c0, %c0_0, %c0_1] : memref<1x8x16xbf16, #tpu.memory_space<vmem>>, vector<1x8x16xbf16>
    %1 = vector.shape_cast %0 : vector<1x8x16xbf16> to vector<8x16xbf16>
    %c0_2 = arith.constant 0 : index
    %c0_3 = arith.constant 0 : index
    %2 = vector.load %arg3[%c0_2, %c0_3] : memref<32x8xbf16, #tpu.memory_space<vmem>>, vector<32x8xbf16>
    %cst = arith.constant dense<0.000000e+00> : vector<32x16xf32>
    %3 = tpu.matmul %2, %1, %cst {dimension_numbers = #tpu.dot_dimension_numbers<[1], [0], [0], [1], [0, 0, 1, 1], [], []>} : vector<32x8xbf16>, vector<8x16xbf16>, vector<32x16xf32> -> vector<32x16xf32>
    %c0_4 = arith.constant 0 : index
    %c0_5 = arith.constant 0 : index
    %4 = vector.load %arg4[%c0_4, %c0_5] : memref<32x1xf32, #tpu.memory_space<vmem>>, vector<32x1xf32>
    %5 = vector.broadcast %4 : vector<32x1xf32> to vector<32x16xf32>
    %6 = arith.addf %3, %5 : vector<32x16xf32>
    %cst_6 = arith.constant 0.000000e+00 : f32
    %7 = vector.broadcast %cst_6 : f32 to vector<32x16xf32>
    %8 = arith.cmpf oge, %6, %7 : vector<32x16xf32>
    %cst_7 = arith.constant 0.00999999977 : f32
    %9 = vector.broadcast %cst_7 : f32 to vector<32x16xf32>
    %10 = arith.mulf %9, %6 : vector<32x16xf32>
    %11 = arith.select %8, %6, %10 : vector<32x16xi1>, vector<32x16xf32>
    %12 = arith.truncf %11 : vector<32x16xf32> to vector<32x16xbf16>
    %c0_8 = arith.constant 0 : index
    %c0_9 = arith.constant 0 : index
    %13 = vector.load %arg5[%c0_8, %c0_9] : memref<32x32xbf16, #tpu.memory_space<vmem>>, vector<32x32xbf16>
    %cst_10 = arith.constant dense<0.000000e+00> : vector<32x16xf32>
    %14 = tpu.matmul %13, %12, %cst_10 {dimension_numbers = #tpu.dot_dimension_numbers<[1], [0], [0], [1], [0, 0, 1, 1], [], []>} : vector<32x32xbf16>, vector<32x16xbf16>, vector<32x16xf32> -> vector<32x16xf32>
    %c0_11 = arith.constant 0 : index
    %c0_12 = arith.constant 0 : index
    %15 = vector.load %arg6[%c0_11, %c0_12] : memref<32x1xf32, #tpu.memory_space<vmem>>, vector<32x1xf32>
    %16 = vector.broadcast %15 : vector<32x1xf32> to vector<32x16xf32>
    %17 = arith.addf %14, %16 : vector<32x16xf32>
    %cst_13 = arith.constant 0.000000e+00 : f32
    %18 = vector.broadcast %cst_13 : f32 to vector<32x16xf32>
    %19 = arith.cmpf oge, %17, %18 : vector<32x16xf32>
    %cst_14 = arith.constant 0.00999999977 : f32
    %20 = vector.broadcast %cst_14 : f32 to vector<32x16xf32>
    %21 = arith.mulf %20, %17 : vector<32x16xf32>
    %22 = arith.select %19, %17, %21 : vector<32x16xi1>, vector<32x16xf32>
    %23 = arith.truncf %22 : vector<32x16xf32> to vector<32x16xbf16>
    %c0_15 = arith.constant 0 : index
    %c0_16 = arith.constant 0 : index
    %24 = vector.load %arg7[%c0_15, %c0_16] : memref<16x32xbf16, #tpu.memory_space<vmem>>, vector<16x32xbf16>
    %cst_17 = arith.constant dense<0.000000e+00> : vector<16x16xf32>
    %25 = tpu.matmul %24, %23, %cst_17 {dimension_numbers = #tpu.dot_dimension_numbers<[1], [0], [0], [1], [0, 0, 1, 1], [], []>} : vector<16x32xbf16>, vector<32x16xbf16>, vector<16x16xf32> -> vector<16x16xf32>
    %c0_18 = arith.constant 0 : index
    %c0_19 = arith.constant 0 : index
    %26 = vector.load %arg8[%c0_18, %c0_19] : memref<16x1xf32, #tpu.memory_space<vmem>>, vector<16x1xf32>
    %27 = vector.broadcast %26 : vector<16x1xf32> to vector<16x16xf32>
    %28 = arith.addf %25, %27 : vector<16x16xf32>
    %cst_20 = arith.constant 0.000000e+00 : f32
    %29 = vector.broadcast %cst_20 : f32 to vector<16x16xf32>
    %30 = arith.cmpf oge, %28, %29 : vector<16x16xf32>
    %cst_21 = arith.constant 0.00999999977 : f32
    %31 = vector.broadcast %cst_21 : f32 to vector<16x16xf32>
    %32 = arith.mulf %31, %28 : vector<16x16xf32>
    %33 = arith.select %30, %28, %32 : vector<16x16xi1>, vector<16x16xf32>
    %34 = arith.truncf %33 : vector<16x16xf32> to vector<16x16xbf16>
    %c0_22 = arith.constant 0 : index
    %c0_23 = arith.constant 0 : index
    %35 = vector.load %arg9[%c0_22, %c0_23] : memref<1x16xbf16, #tpu.memory_space<vmem>>, vector<1x16xbf16>
    %cst_24 = arith.constant dense<0.000000e+00> : vector<1x16xf32>
    %36 = tpu.matmul %35, %34, %cst_24 {dimension_numbers = #tpu.dot_dimension_numbers<[1], [0], [0], [1], [0, 0, 1, 1], [], []>} : vector<1x16xbf16>, vector<16x16xbf16>, vector<1x16xf32> -> vector<1x16xf32>
    %c0_25 = arith.constant 0 : index
    %c0_26 = arith.constant 0 : index
    %37 = vector.load %arg10[%c0_25, %c0_26] : memref<1x1xf32, #tpu.memory_space<vmem>>, vector<1x1xf32>
    %38 = vector.broadcast %37 : vector<1x1xf32> to vector<1x16xf32>
    %39 = arith.addf %36, %38 : vector<1x16xf32>
    %c0_27 = arith.constant 0 : index
    %c0_28 = arith.constant 0 : index
    %c0_29 = arith.constant 0 : index
    %40 = vector.load %arg2[%c0_27, %c0_28, %c0_29] : memref<1x1x16xi32, #tpu.memory_space<vmem>>, vector<1x1x16xi32>
    %41 = vector.shape_cast %40 : vector<1x1x16xi32> to vector<1x16xi32>
    %c0_i32 = arith.constant 0 : i32
    %42 = vector.broadcast %c0_i32 : i32 to vector<1x16xi32>
    %43 = arith.cmpi ne, %41, %42 : vector<1x16xi32>
    %cst_30 = arith.constant 0xFF800000 : f32
    %44 = vector.broadcast %cst_30 : f32 to vector<1x16xf32>
    %45 = arith.select %43, %39, %44 : vector<1x16xi1>, vector<1x16xf32>
    %cst_31 = arith.constant dense<0xFF800000> : vector<1xf32>
    %46 = vector.multi_reduction <maximumf>, %45, %cst_31 [1] : vector<1x16xf32> to vector<1xf32>
    %47 = vector.shape_cast %46 : vector<1xf32> to vector<1x1xf32>
    %48 = vector.broadcast %47 : vector<1x1xf32> to vector<1x16xf32>
    %49 = arith.subf %45, %48 : vector<1x16xf32>
    %50 = math.exp %49 : vector<1x16xf32>
    %cst_32 = arith.constant dense<0.000000e+00> : vector<1xf32>
    %51 = vector.multi_reduction <add>, %50, %cst_32 [1] : vector<1x16xf32> to vector<1xf32>
    %52 = vector.shape_cast %51 : vector<1xf32> to vector<1x1xf32>
    %53 = vector.broadcast %52 : vector<1x1xf32> to vector<1x16xf32>
    %54 = arith.divf %50, %53 : vector<1x16xf32>
    %c0_33 = arith.constant 0 : index
    %c0_34 = arith.constant 0 : index
    %c0_35 = arith.constant 0 : index
    %55 = vector.load %arg11[%c0_33, %c0_34, %c0_35] : memref<1x1x16xf32, #tpu.memory_space<vmem>>, vector<1x1x16xf32>
    %56 = vector.shape_cast %55 : vector<1x1x16xf32> to vector<1x16xf32>
    %57 = vector.shape_cast %54 : vector<1x16xf32> to vector<1x1x16xf32>
    tpu.vector_store %arg11[%c0_33, %c0_34, %c0_35], %57 {strides = array<i32>} : memref<1x1x16xf32, #tpu.memory_space<vmem>>, vector<1x1x16xf32>,
    return
  }
  func.func @transform_0(%arg0: i32) -> (i32, i32, i32) {
    %c0_i32 = arith.constant 0 : i32
    %c0_i32_0 = arith.constant 0 : i32
    %c0_i32_1 = arith.constant 0 : i32
    return %arg0, %c0_i32, %c0_i32_0 : i32, i32, i32
  }
  func.func @transform_1(%arg0: i32) -> (i32, i32, i32) {
    %c0_i32 = arith.constant 0 : i32
    %c0_i32_0 = arith.constant 0 : i32
    %c0_i32_1 = arith.constant 0 : i32
    return %arg0, %c0_i32, %c0_i32_0 : i32, i32, i32
  }
  func.func @transform_2(%arg0: i32) -> (i32, i32) {
    %c0_i32 = arith.constant 0 : i32
    %c0_i32_0 = arith.constant 0 : i32
    %c0_i32_1 = arith.constant 0 : i32
    return %c0_i32, %c0_i32_0 : i32, i32
  }
  func.func @transform_3(%arg0: i32) -> (i32, i32) {
    %c0_i32 = arith.constant 0 : i32
    %c0_i32_0 = arith.constant 0 : i32
    %c0_i32_1 = arith.constant 0 : i32
    return %c0_i32, %c0_i32_0 : i32, i32
  }
  func.func @transform_4(%arg0: i32) -> (i32, i32) {
    %c0_i32 = arith.constant 0 : i32
    %c0_i32_0 = arith.constant 0 : i32
    %c0_i32_1 = arith.constant 0 : i32
    return %c0_i32, %c0_i32_0 : i32, i32
  }
  func.func @transform_5(%arg0: i32) -> (i32, i32) {
    %c0_i32 = arith.constant 0 : i32
    %c0_i32_0 = arith.constant 0 : i32
    %c0_i32_1 = arith.constant 0 : i32
    return %c0_i32, %c0_i32_0 : i32, i32
  }
  func.func @transform_6(%arg0: i32) -> (i32, i32) {
    %c0_i32 = arith.constant 0 : i32
    %c0_i32_0 = arith.constant 0 : i32
    %c0_i32_1 = arith.constant 0 : i32
    return %c0_i32, %c0_i32_0 : i32, i32
  }
  func.func @transform_7(%arg0: i32) -> (i32, i32) {
    %c0_i32 = arith.constant 0 : i32
    %c0_i32_0 = arith.constant 0 : i32
    %c0_i32_1 = arith.constant 0 : i32
    return %c0_i32, %c0_i32_0 : i32, i32
  }
  func.func @transform_8(%arg0: i32) -> (i32, i32) {
    %c0_i32 = arith.constant 0 : i32
    %c0_i32_0 = arith.constant 0 : i32
    %c0_i32_1 = arith.constant 0 : i32
    return %c0_i32, %c0_i32_0 : i32, i32
  }
  func.func @transform_9(%arg0: i32) -> (i32, i32) {
    %c0_i32 = arith.constant 0 : i32
    %c0_i32_0 = arith.constant 0 : i32
    %c0_i32_1 = arith.constant 0 : i32
    return %c0_i32, %c0_i32_0 : i32, i32
  }
  func.func @transform_10(%arg0: i32) -> (i32, i32, i32) {
    %c0_i32 = arith.constant 0 : i32
    %c0_i32_0 = arith.constant 0 : i32
    %c0_i32_1 = arith.constant 0 : i32
    return %arg0, %c0_i32, %c0_i32_0 : i32, i32, i32
  }
}

</mosaic_0001>

<bundles_post_ra>
// kernel: tpu_custom_call.1
= control target key start
LH: loop header
LB: loop body
LE: loop exit
PB: predicated region body
PF: predicated region fallthrough
CT: control target
= control target key end

     0   :  { %s1060_s0 = inlined_call_operand.vmem [shape: bf16[2,8,16], index: 0, kind: input, shape index: {}]   ;;  %s1061_s1 = inlined_call_operand.vmem [shape: s32[2,1,16], index: 1, kind: input, shape index: {}]   ;;  %s1062_s2 = inlined_call_operand.vmem [shape: bf16[32,8], index: 2, kind: input, shape index: {}]   ;;  %s1063_s3 = inlined_call_operand.vmem [shape: f32[32,1], index: 3, kind: input, shape index: {}]   ;;  %s1064_s4 = inlined_call_operand.vmem [shape: bf16[32,32], index: 4, kind: input, shape index: {}]   ;;  %s1065_s5 = inlined_call_operand.vmem [shape: f32[32,1], index: 5, kind: input, shape index: {}]   ;;  %s1066_s6 = inlined_call_operand.vmem [shape: bf16[16,32], index: 6, kind: input, shape index: {}]   ;;  %s1067_s7 = inlined_call_operand.vmem [shape: f32[16,1], index: 7, kind: input, shape index: {}]   ;;  %s1068_s8 = inlined_call_operand.vmem [shape: bf16[1,16], index: 8, kind: input, shape index: {}]   ;;  %s1069_s9 = inlined_call_operand.<no memory space> [shape: f32[1,1], index: 9, kind: input, shape index: {}]   ;;  %s1070_s10 = inlined_call_operand.hbm [shape: f32[2,1,16], index: 10, kind: output, shape index: {}]  }
   0x1   :  { %v15_v0 = vstv %s1069_s9 }
   0x2   :  { %16 = vst [vmem:[#allocation2] sm:$0x1] %v15_v0 }
   0x3   :  { %17 = vsyncpa [#allocation4], 0 }
   0x4   :  { %19 = vsyncpa [#allocation4 + $0x1], 0  ;;  %s914_s15 = smov 0   ;;  %s916_s16 = smov 0  }
   0x5   :  { %s918_s17 = smov 0   ;;  %s920_s18 = smov 0  }
   0x6 LB: > { %s935_s9 = sadd.s32 4294967295, %s853_s18   ;;  %s706_s19 = sadd.s32 4294967294, %s853_s18   ;;  %s853_s18 = sphi %s920_s18, %s1076_s18   ;;  %s849_s17 = sphi %s918_s17, %s1075_s17   ;;  %s845_s16 = sphi %s916_s16, %s1074_s16   ;;  %s841_s15 = sphi %s914_s15, %s1073_s15  }
   0x7   : > { %s939_s20 = sadd.s32 1, %s853_s18   ;;  %s252_s21 = sadd.s32 1, %s849_s17 }
   0x8   : > { %s249_s22 = ssub.s32 %s853_s18, %s939_s20  ;;  %p262_p0 = scmp.ne.s32.totalorder %s849_s17, %s845_s16 }
   0x9   : > { %p250_p1 = scmp.eq.s32.totalorder %s249_s22, 0  ;;  %p263_p2 = scmp.eq.s32.totalorder %s935_s9, 1 }
   0xa   : > { %p268_p3 = scmp.ne.s32.totalorder %s845_s16, %s841_s15  ;;  %p269_p4 = scmp.eq.s32.totalorder %s706_s19, 1 }
   0xb   : > { %s950_s23 = scalar_select %p250_p1, %s849_s17, %s252_s21  }
   0xc   : > { %p952_p5 = por %p263_p2, %p262_p0  ;;  %p956_p6 = por %p269_p4, %p268_p3 }
   0xd   : > { %p709_p7 = scmp.ge.s32.totalorder %s853_s18, 1  ;;  %p324_p8 = scmp.lt.s32.totalorder %s853_s18, 3 }
   0xf   : > { %p325_p9 = pnand %p709_p7, %p324_p8 }
  0x10   : > { %p363_p10 = scmp.lt.s32.totalorder (!%p325_p9), %s935_s9, 1  ;;  %s638_s19 = scalar_lea.hbm (!%p325_p9), %s1070_s10, %s935_s9 }
  0x11   : > { %328 = sbr.rel (%p325_p9) target bundleno = 911 (0x38f), region = 60  ;;  %s642_s26 = sshll.u32 (!%p325_p9), %s638_s19, 4  ;;  %s643_s26 = int_to_ptr.hbm [resolvable:$true] %s642_s26 }
  0x12   : > { %s805_s28 = sshra.s32 (!%p325_p9), %s643_s26, 4  ;;  %s806_s28 = int_to_ptr.hbm [resolvable:$true] %s805_s28 }
  0x13   : > { %p812_p0 = scmp.lt.s32.totalorder (!%p325_p9), %s806_s28, %s1070_s10 }
  0x16   : > { %v378_v1 = vld [vmem:[%s1063_s3 + $0x10] sm:$0xff]  ;;  %v855_v2 = vmov 0   ;;  %v376_v3 = vld [vmem:[%s1063_s3] sm:$0xff]  ;;  %s970_s30 = scalar_select %p363_p10, %s935_s9, 1  ;;  %vm417_vm0 = vcmask 1043456   ;;  %v379_v7 = vld [vmem:[%s1063_s3 + $0x18] sm:$0xff] }
  0x17   : > { %784 = vset.pattern.permute.xlu0 %v855_v2  ;;  %785 = vset.pattern.permute.xlu1 %v855_v2  ;;  %v739_v6 = vld [vmem:[%s1062_s2] sm:$0xff]  ;;  %v377_v8 = vld [vmem:[%s1063_s3 + $0x8] sm:$0xff]  ;;  %vm410_vm1 = vcmask 64512   ;;  %v460_v22 = vld [vmem:[%s1065_s5 + $0x10] sm:$0xff]  ;;  %vm492_vm6 = vcmask 261120   ;;  %vm583_vm13 = vcmask 130048  }
  0x18   : > { %392 = vperm.xlu0 %784, %v378_v1   ;;  %382 = vperm.xlu1 %785, %v376_v3   ;;  %s710_s11 = sshll.u32 %s970_s30, 2  ;;  %v458_v9 = vld [vmem:[%s1065_s5] sm:$0xff]  ;;  %v459_v10 = vld [vmem:[%s1065_s5 + $0x8] sm:$0xff]  ;;  %v461_v33 = vld [vmem:[%s1065_s5 + $0x18] sm:$0xff]  ;;  %s369_s12 = scalar_lea.vmem %s1061_s1, %s970_s30  ;;  %vm603_vm15 = vcmask 122880  }
  0x19   : > { %786 = vset.pattern.permute.xlu2 %v855_v2  ;;  %s366_s14 = scalar_lea.vmem %s1060_s0, %s710_s11  ;;  %v740_v11 = vld [vmem:[%s1062_s2 + $0x8] sm:$0xff]  ;;  %v576_v13 = vld [vmem:[#allocation2] sm:$0x1]  ;;  %s361_s30 = sand.u32 1, %s845_s16  }
  0x1a   : > { %v371_v4 = vld [vmem:[%s366_s14] sm:$0xf]  ;;  %v535_v12 = vld [vmem:[%s1067_s7 + $0x8] sm:$0xff]  ;;  %474 = vperm.xlu2 %786, %v460_v22   ;;  %s362_s21 = scalar_lea.vmem [#allocation3], %s361_s30  ;;  %s630_s27 = scalar_lea.sflag [#allocation4], %s361_s30 }
  0x1b   : > { %v419_v5 = vsel %vm417_vm0, %v371_v4, 0  ;;  %v741_v38 = vld [vmem:[%s1064_s4] sm:$0xff]  ;;  %v742_v40 = vld [vmem:[%s1064_s4 + $0x8] sm:$0xff]  ;;  %s640_s22 = sshll.u32 %s362_s21, 4  ;;  %s807_s9 = scalar_lea.hbm %s806_s28, 1  ;;  %s641_s22 = int_to_ptr.vmem [resolvable:$true] %s640_s22 }
  0x1c   : > { %428 = vmatpush.bf16.msra.mxu0 %v419_v5  ;;  %v534_v39 = vld [vmem:[%s1067_s7] sm:$0xff]  ;;  %p808_p11 = scmp.ne.s32.totalorder %s806_s28, %s807_s9 }
  0x1d   : > { %v743_v63 = vld [vmem:[%s1066_s6] sm:$0xff] }
  0x1e   : > { %p809_p12 = pnand %p808_p11, %p952_p5 }
  0x1f   : > { %719 = vmatmul.msk.bf16.vlgmr.msra.gmra.mxu0 %vm410_vm1, %v739_v6 }
  0x20   : > { %397 = vperm.xlu0 %784, %v379_v7   ;;  %387 = vperm.xlu1 %785, %v377_v8   ;;  %p810_p13 = pneg %p809_p12 }
  0x22   : > { %479 = vperm.xlu2 %786, %v461_v33  }
  0x28   : > { %464 = vperm.xlu0 %784, %v458_v9   ;;  %469 = vperm.xlu1 %785, %v459_v10  }
  0x2a   : > { %538 = vperm.xlu2 %786, %v534_v39  }
  0x2f   : > { %720 = vmatmul.msk.bf16.gmra.mxu0 %vm410_vm1, %v740_v11  ;;  %v575_v11 = vld [vmem:[%s1068_s8] sm:$0x1] }
  0x30   : > { %543 = vperm.xlu0 %784, %v535_v12   ;;  %579 = vperm.xlu1 %785, %v576_v13   ;;  %v600_v13 = vld [vmem:[%s369_s12] sm:$0x1]  ;;  %s811_s12 = scalar_lea.hbm %s1070_s10, 2 }
  0x31   : > { %vm601_vm14 = vcmp.ne.s32.totalorder %v600_v13, 0  ;;  %p813_p1 = scmp.lt.s32.totalorder %s811_s12, %s807_s9 }
  0x33   : > { %p814_p2 = por %p813_p1, %p812_p0 }
  0x35   : > { %p815_p3 = pnand %p814_p2, %p810_p13 }
  0x74   : > { %v475_v43 = vpop.permute.xlu2 %474 }
  0x7c   : > { %v480_v49 = vpop.permute.xlu2 %479 }
  0x84   : > { %v539_v1 = vpop.permute.xlu2 %538 }
  0x8a   : > { %v383_v16 = vpop.permute.xlu1 %382  ;;  %v393_v17 = vpop.permute.xlu0 %392 }
  0x92   : > { %v388_v20 = vpop.permute.xlu1 %387  ;;  %v398_v23 = vpop.permute.xlu0 %397 }
  0x9a   : > { %v470_v46 = vpop.permute.xlu1 %469  ;;  %v465_v47 = vpop.permute.xlu0 %464 }
  0x9c   : > { %v430_v14 = vpop.f32.mrf.mxu0 }
  0x9d   : > { %v431_v25 = vadd.f32 %v430_v14, %v383_v16 }
  0x9f   : > { %v444_v30 = vmul.f32 0.01, %v431_v25  ;;  %vm440_vm5 = vcmp.ge.f32.partialorder %v431_v25, 0.0 }
  0xa1   : > { %v448_v36 = vsel %vm440_vm5, %v431_v25, %v444_v30 }
  0xa2   : > { %v544_v3 = vpop.permute.xlu0 %543  ;;  %v580_v12 = vpop.permute.xlu1 %579 }
  0xa3   : > { %v582_v14 = vperm.slane %v580_v12, 0 }
  0xa4   : > { %v432_v15 = vpop.f32.mrf.mxu0 }
  0xa5   : > { %v433_v21 = vadd.f32 %v432_v15, %v388_v20 }
  0xa7   : > { %v445_v28 = vmul.f32 0.01, %v433_v21  ;;  %vm441_vm4 = vcmp.ge.f32.partialorder %v433_v21, 0.0 }
  0xa9   : > { %v449_v35 = vsel %vm441_vm4, %v433_v21, %v445_v28 }
  0xaa   : > { %v452_v37 = vpack.c.bf16 %v449_v35, %v448_v36 }
  0xac   : > { %v435_v18 = vpop.f32.mrf.mxu0 }
  0xad   : > { %v436_v19 = vadd.f32 %v435_v18, %v393_v17 }
  0xaf   : > { %v446_v26 = vmul.f32 0.01, %v436_v19  ;;  %vm442_vm2 = vcmp.ge.f32.partialorder %v436_v19, 0.0 }
  0xb1   : > { %v450_v31 = vsel %vm442_vm2, %v436_v19, %v446_v26 }
  0xb4   : > { %v437_v24 = vpop.f32.mrf.mxu0 }
  0xb5   : > { %v438_v27 = vadd.f32 %v437_v24, %v398_v23 }
  0xb7   : > { %v447_v29 = vmul.f32 0.01, %v438_v27  ;;  %vm443_vm3 = vcmp.ge.f32.partialorder %v438_v27, 0.0 }
  0xb9   : > { %v451_v32 = vsel %vm443_vm3, %v438_v27, %v447_v29 }
  0xba   : > { %v453_v34 = vpack.c.bf16 %v451_v32, %v450_v31 }
  0xbc   : > { %505 = vmatpush.bf16.msra.mxu1 %v453_v34 }
  0xc0   : > { %506 = vmatpush.bf16.msra.mxu1 %v452_v37 }
  0xc3   : > { %729 = vmatmul.msk.bf16.vlgmr.msra.gmra.mxu1 %vm492_vm6, %v741_v38 }
  0xd3   : > { %730 = vmatmul.msk.bf16.gmra.mxu1 %vm492_vm6, %v742_v40 }
 0x140   : > { %v508_v41 = vpop.f32.mrf.mxu1 }
 0x141   : > { %v509_v51 = vadd.f32 %v508_v41, %v465_v47 }
 0x143   : > { %v522_v56 = vmul.f32 0.01, %v509_v51  ;;  %vm518_vm10 = vcmp.ge.f32.partialorder %v509_v51, 0.0 }
 0x145   : > { %v526_v61 = vsel %vm518_vm10, %v509_v51, %v522_v56 }
 0x148   : > { %v510_v42 = vpop.f32.mrf.mxu1 }
 0x149   : > { %v511_v48 = vadd.f32 %v510_v42, %v470_v46 }
 0x14b   : > { %v523_v54 = vmul.f32 0.01, %v511_v48  ;;  %vm519_vm9 = vcmp.ge.f32.partialorder %v511_v48, 0.0 }
 0x14d   : > { %v527_v60 = vsel %vm519_vm9, %v511_v48, %v523_v54 }
 0x14e   : > { %v530_v62 = vpack.c.bf16 %v527_v60, %v526_v61 }
 0x150   : > { %v513_v44 = vpop.f32.mrf.mxu1 }
 0x151   : > { %v514_v45 = vadd.f32 %v513_v44, %v475_v43 }
 0x153   : > { %v524_v52 = vmul.f32 0.01, %v514_v45  ;;  %vm520_vm7 = vcmp.ge.f32.partialorder %v514_v45, 0.0 }
 0x155   : > { %v528_v57 = vsel %vm520_vm7, %v514_v45, %v524_v52 }
 0x158   : > { %v515_v50 = vpop.f32.mrf.mxu1 }
 0x159   : > { %v516_v53 = vadd.f32 %v515_v50, %v480_v49 }
 0x15b   : > { %v525_v55 = vmul.f32 0.01, %v516_v53  ;;  %vm521_vm8 = vcmp.ge.f32.partialorder %v516_v53, 0.0 }
 0x15d   : > { %v529_v58 = vsel %vm521_vm8, %v516_v53, %v525_v55 }
 0x15e   : > { %v531_v59 = vpack.c.bf16 %v529_v58, %v528_v57 }
 0x160   : > { %560 = vmatpush.bf16.msra.mxu2 %v531_v59 }
 0x164   : > { %561 = vmatpush.bf16.msra.mxu2 %v530_v62 }
 0x167   : > { %735 = vmatmul.msk.bf16.vlgmr.msra.gmra.mxu2 %vm492_vm6, %v743_v63 }
 0x1ea   : > { %v563_v0 = vpop.f32.mrf.mxu2 }
 0x1eb   : > { %v564_v2 = vadd.f32 %v563_v0, %v539_v1 }
 0x1ed   : > { %v570_v5 = vmul.f32 0.01, %v564_v2  ;;  %vm568_vm11 = vcmp.ge.f32.partialorder %v564_v2, 0.0 }
 0x1ef   : > { %v572_v8 = vsel %vm568_vm11, %v564_v2, %v570_v5 }
 0x1f2   : > { %v565_v4 = vpop.f32.mrf.mxu2 }
 0x1f3   : > { %v566_v6 = vadd.f32 %v565_v4, %v544_v3 }
 0x1f5   : > { %v571_v7 = vmul.f32 0.01, %v566_v6  ;;  %vm569_vm12 = vcmp.ge.f32.partialorder %v566_v6, 0.0 }
 0x1f7   : > { %v573_v9 = vsel %vm569_vm12, %v566_v6, %v571_v7 }
 0x1f8   : > { %v574_v10 = vpack.c.bf16 %v573_v9, %v572_v8 }
 0x1fa   : > { %594 = vmatpush.bf16.msra.mxu3 %v574_v10 }
 0x1fd   : > { %736 = vmatmul.msk.bf16.vlgmr.msra.gmra.mxu3 %vm583_vm13, %v575_v11 }
 0x280   : > { %v596_v15 = vpop.f32.mrf.mxu3 }
 0x281   : > { %v597_v16 = vadd.f32 %v596_v15, %v582_v14 }
 0x283   : > { %v602_v17 = vsel %vm601_vm14, %v597_v16, -inf }
 0x284   : > { %v604_v18 = vsel %vm603_vm15, %v602_v17, -inf }
 0x285   : > { %605 = vmax.xlane.f32.xlu2 %v604_v18 }
 0x288   : > { %v598_v19 = vpop.f32.mrf.mxu3 }
 0x2f8   : > { %v606_v20 = vpop.xlane.xlu2 %605 }
 0x2f9   : > { %v607_v21 = vsub.f32 %v602_v17, %v606_v20 }
 0x2fb   : > { %v608_v22 = vmul.f32 1.442695, %v607_v21 }
 0x2fd   : > { %787 = vpow2.f32 %v608_v22 }
 0x303   : > { %v788_v23 = vpop.eup %787 }
 0x304   : > { %v610_v24 = vsel %vm603_vm15, %v788_v23, 0.0 }
 0x305   : > { %611 = vadd.xlane.f32.xlu0 %v610_v24 }
 0x378   : > { %v612_v25 = vpop.xlane.xlu0 %611 }
 0x379   : > { %789 = vrcp.f32 %v612_v25  ;;  %v624_v29 = vand.u32 2147483648, %v612_v25  ;;  %v622_v31 = vand.u32 2147483647, %v612_v25  ;;  %vm618_vm1 = vweird.f32 %v612_v25 }
 0x37b   : > { %v625_v33 = vor.u32 1.1754944e-38, %v624_v29  ;;  %vm623_vm3 = vcmp.eq.f32.partialorder %v622_v31, 8.507059e+37 }
 0x37f   : > { %v790_v26 = vpop.eup %789 }
 0x380   : > { %v614_v27 = vmul.f32 %v790_v26, %v612_v25  ;;  %vm619_vm0 = vweird.f32 %v790_v26 }
 0x381   : > { %vm620_vm2 = vmor %vm618_vm1, %vm619_vm0 }
 0x382   : > { %v615_v28 = vsub.f32 1.0, %v614_v27 }
 0x384   : > { %v616_v30 = vmul.f32 %v790_v26, %v615_v28 }
 0x386   : > { %v617_v32 = vadd.f32 %v790_v26, %v616_v30 }
 0x388   : > { %v621_v34 = vsel %vm620_vm2, %v790_v26, %v617_v32 }
 0x389   : > { %v626_v35 = vsel %vm623_vm3, %v625_v33, %v621_v34 }
 0x38a   : > { %v627_v36 = vmul.f32 %v788_v23, %v626_v35 }
 0x38c   : > { %628 = vst.msk [vmem:[%s362_s21] sm:$0x1] %vm603_vm15, %v627_v36 }
 0x38d   : > { %818 = shalt.err (!%p815_p3)
}
 0x38e   : > { %744 = dma.vmem_to_hbm [thread:$0]  (%p952_p5), %s641_s22, 16, %s643_s26, %s630_s27  }
 0x38f PF: > { %p750_p4 = scmp.ge.s32.totalorder %s853_s18, 2  ;;  %s654_s30 = sand.u32 1, %s841_s15  }
 0x390   : > { %s655_s19 = scalar_lea.sflag [#allocation4], %s654_s30 }
 0x391   : > { %p747_p7 = pnand %p750_p4, %p956_p6 }
 0x393   : > { %p748_p8 = pneg %p747_p7 }
 0x395   : > { %836 = dma.done.wait (%p748_p8), %s655_s19, 16  }
 0x396   : > { %838 = vsyncadd (%p748_p8), %s655_s19, 4294967280  ;;  %p22_p9 = scmp.ge.s32.totalorder %s939_s20, 4   ;;  %s1073_s15 = smov %s845_s16 }
 0x397   : > { %s1074_s16 = smov %s849_s17  ;;  %s1075_s17 = smov %s950_s23 }
 0x398   : > { %s1076_s18 = smov %s939_s20  ;;  %24 = sbr.rel (!%p22_p9) target bundleno = 6 (0x6), region = 98 }
 0x39d   :  { %660 = vsyncpa [#allocation4], 1 }
 0x39e   :  { %662 = vsyncpa [#allocation4 + $0x1], 1 }

</bundles_post_ra>
